<compile_context>
chip_gen: v5e
topology: v5e:2x2
jax: 0.10.0
libtpu: 0.0.40
codegen_flags: <defaults>
</compile_context>

<pallas_src>
import functools
import math

import jax
import jax.numpy as jnp
from jax import lax
from jax.experimental import pallas as pl
from jax.experimental.pallas import tpu as pltpu

_VMEM_LIMIT = 48 * 1024 * 1024   # < v7x 64 MiB physical, >> default scoped limits


# ------------------------------ helpers -------------------------------------

def _tile_and_pad(dim, candidates):
    """Return (tile, padded_dim).

    Prefers an exact divisor from `candidates` (descending).  Dims smaller
    than the smallest candidate use the full dim (exempt from the (8,128)
    rule).  Otherwise the largest candidate <= dim is used and the dim is
    padded up to a multiple (no silent full-dim fallback for large dims).
    """
    for c in candidates:
        if c <= dim and dim % c == 0:
            return c, dim
    if dim <= min(candidates):
        return dim, dim
    for c in candidates:
        if c <= dim:
            return c, -(-dim // c) * c
    return dim, dim


def _pad_axis(a, axis, target):
    cur = a.shape[axis]
    if cur == target:
        return a
    pad = [(0, 0)] * a.ndim
    pad[axis] = (0, target - cur)
    return jnp.pad(a, pad)


# ------------------------- tiled linear (x @ W + b) -------------------------

def _linear_kernel(x_ref, w_ref, b_ref, o_ref, acc_ref):
    # blocks: x (tm, tk), w (1, tk, tn), b (1, 1, tn), o (1, tm, tn)
    k = pl.program_id(3)

    @pl.when(k == 0)
    def _():
        acc_ref[...] = jnp.zeros_like(acc_ref)

    acc_ref[...] += jnp.dot(x_ref[...], w_ref[0],
                            preferred_element_type=jnp.float32)

    @pl.when(k == pl.num_programs(3) - 1)
    def _():
        o_ref[0] = (acc_ref[...] + b_ref[0]).astype(o_ref.dtype)


def pallas_linear(x, w_stack, b_stack, out_dtype=None):
    """x: (M, Din); w_stack: (P, Din, Dout); b_stack: (P, Dout) -> (P, M, Dout).

    One call computes P projections of the same input (P=3 fuses Q/K/V for
    self-attention).  Tiled & software-pipelined with a f32 VMEM accumulator;
    the reduction axis is last ("arbitrary"), the rest are "parallel".
    """
    M, Din = x.shape
    P, _, Dout = w_stack.shape
    out_dtype = out_dtype or x.dtype

    # Bigger tiles -> fewer grid steps (0.35 us each) and less x re-streaming.
    tm, mp = _tile_and_pad(M, (512, 256, 128))
    tn, np_ = _tile_and_pad(Dout, (512, 256, 128))
    tk, kp = _tile_and_pad(Din, (2048, 1024, 512, 256))

    x = _pad_axis(_pad_axis(x, 0, mp), 1, kp)
    w_stack = _pad_axis(_pad_axis(w_stack, 1, kp), 2, np_)
    b = _pad_axis(b_stack.astype(jnp.float32), 1, np_).reshape(P, 1, np_)

    grid = (P, mp // tm, np_ // tn, kp // tk)
    out = pl.pallas_call(
        _linear_kernel,
        out_shape=jax.ShapeDtypeStruct((P, mp, np_), out_dtype),
        grid=grid,
        in_specs=[
            pl.BlockSpec((tm, tk), lambda p, i, j, k: (i, k)),
            pl.BlockSpec((1, tk, tn), lambda p, i, j, k: (p, k, j)),
            pl.BlockSpec((1, 1, tn), lambda p, i, j, k: (p, 0, j)),
        ],
        out_specs=pl.BlockSpec((1, tm, tn), lambda p, i, j, k: (p, i, j)),
        scratch_shapes=[pltpu.VMEM((tm, tn), jnp.float32)],
        compiler_params=pltpu.CompilerParams(
            dimension_semantics=("parallel", "parallel", "parallel",
                                 "arbitrary"),
            vmem_limit_bytes=_VMEM_LIMIT),
    )(x, w_stack, b)

    if mp != M or np_ != Dout:
        out = out[:, :M, :Dout]
    return out


# ------------------------ flash attention (+W_o) kernel ----------------------

def _flash_attention_kernel(*refs, n_heads, scale, kv_len, is_causal, has_mask,
                            fuse_wo):
    idx = 0
    m_ref = None
    if has_mask:
        m_ref = refs[idx]; idx += 1
    q_ref, k_ref, v_ref = refs[idx:idx + 3]; idx += 3
    wo_ref = bo_ref = None
    if fuse_wo:
        wo_ref, bo_ref = refs[idx:idx + 2]; idx += 2
    o_ref = refs[idx]; idx += 1
    qh_sc, m_sc, l_sc, acc_sc = refs[idx:idx + 4]

    H = n_heads
    tq, D = q_ref.shape[2], q_ref.shape[3]
    tkv = k_ref.shape[2]
    d_k = D // H

    kv = pl.program_id(2)
    q_start = pl.program_id(1) * tq
    kv_start = kv * tkv

    @pl.when(kv == 0)
    def _():
        # Head split, relayout (batch axis leading) and the 1/sqrt(d_k) scale
        # happen ONCE per q tile, not per kv step.
        q = q_ref[0, 0].reshape(tq, H, d_k)
        qh_sc[...] = (jnp.swapaxes(q, 0, 1).astype(jnp.float32)
                      * jnp.float32(scale)).astype(qh_sc.dtype)
        m_sc[...] = jnp.full_like(m_sc, -jnp.inf)
        l_sc[...] = jnp.zeros_like(l_sc)
        acc_sc[...] = jnp.zeros_like(acc_sc)

    def _compute():
        # K/V head split + relayout once per kv block, batch axis leading.
        kh = jnp.swapaxes(k_ref[0, 0].reshape(tkv, H, d_k), 0, 1)  # (H,tkv,dk)
        vh = jnp.swapaxes(v_ref[0, 0].reshape(tkv, H, d_k), 0, 1)  # (H,tkv,dk)

        # (H,tq,dk) x (H,tkv,dk) -> (H,tq,tkv); f32 accumulation on the MXU.
        s = lax.dot_general(qh_sc[...], kh, (((2,), (2,)), ((0,), (0,))),
                            preferred_element_type=jnp.float32)

        neg = jnp.float32(-1e9)
        if has_mask:
            s = jnp.where(m_ref[0, 0] != 0, s, neg)          # int8 0/1 mask
        if is_causal or (kv_len is not None):
            k_pos = kv_start + lax.broadcasted_iota(jnp.int32, (tq, tkv), 1)
            if is_causal:
                q_pos = q_start + lax.broadcasted_iota(jnp.int32, (tq, tkv), 0)
                keep = k_pos <= q_pos
                if kv_len is not None:
                    keep = jnp.logical_and(keep, k_pos < kv_len)
            else:
                keep = k_pos < kv_len                          # padded keys
            s = jnp.where(keep[None], s, neg)

        # Online softmax — math stays f32 (v5e VPU/EUP have no bf16).
        m_prev = m_sc[...]
        m_new = jnp.maximum(m_prev, jnp.max(s, axis=-1, keepdims=True))
        alpha = jnp.exp(m_prev - m_new)
        p = jnp.exp(s - m_new)
        l_sc[...] = alpha * l_sc[...] + jnp.sum(p, axis=-1, keepdims=True)
        acc_sc[...] = alpha * acc_sc[...] + lax.dot_general(
            p.astype(vh.dtype), vh, (((2,), (1,)), ((0,), (0,))),
            preferred_element_type=jnp.float32)
        m_sc[...] = m_new
        # TODO(synk): nn.Dropout on the attention weights is identity here.

    if is_causal:
        # Skip kv tiles entirely above the causal diagonal (≈ halves
        # MXU/EUP/VPU work for causal attention).
        pl.when(kv_start <= q_start + tq - 1)(_compute)
    else:
        _compute()

    @pl.when(kv == pl.num_programs(2) - 1)
    def _():
        inv_l = pl.reciprocal(l_sc[...], approx=True)         # EUP slot
        ctx = acc_sc[...] * inv_l                             # (H, tq, d_k) f32
        ctx = jnp.swapaxes(ctx, 0, 1).reshape(tq, D)          # lane-dense (tq,D)
        if fuse_wo:
            out = jnp.dot(ctx.astype(wo_ref.dtype), wo_ref[...],
                          preferred_element_type=jnp.float32) + bo_ref[...]
        else:
            out = ctx
        o_ref[0] = out.astype(o_ref.dtype)


def pallas_flash_attention(qkv_arrs, qkv_idxs, n_heads, *, scale, mask=None,
                           is_causal=False, wo=None, bo=None, out_dtype=None):
    """qkv_arrs: three (P, B, S, D) arrays (may alias one stacked buffer);
    qkv_idxs: static leading index picking Q/K/V in each array.
    mask: None or (Bm, 1, S, S) int8 0/1 with Bm in {1, B}.
    wo/bo: optional fused output projection (wo: (D, D), bo: (D,)).
    Returns (B, S, D) in out_dtype."""
    q_arr, k_arr, v_arr = qkv_arrs
    _, B, S, D = q_arr.shape
    out_dtype = out_dtype or q_arr.dtype
    H = n_heads
    d_k = D // H

    # Query tiles capped at 256 (v7x 64 MiB / v5e scoped VMEM), kv tiles up to
    # 512; per-tile VMEM is independent of S.
    tq, sq_pad = _tile_and_pad(S, (256, 128))
    tkv, skv_pad = _tile_and_pad(S, (512, 256, 128))
    s_pad = max(sq_pad, skv_pad)
    kv_len = S if skv_pad != S else None     # mask zero-padded keys in-kernel

    if q_arr is k_arr and k_arr is v_arr:
        q_arr = k_arr = v_arr = _pad_axis(q_arr, 2, s_pad)
    else:
        q_arr = _pad_axis(q_arr, 2, s_pad)
        k_arr = _pad_axis(k_arr, 2, s_pad)
        v_arr = _pad_axis(v_arr, 2, s_pad)

    grid = (B, sq_pad // tq, skv_pad // tkv)

    in_specs, operands = [], []
    if mask is not None:
        mask = _pad_axis(_pad_axis(mask, 2, sq_pad), 3, skv_pad)
        if mask.shape[0] == B:
            m_spec = pl.BlockSpec((1, 1, tq, tkv),
                                  lambda b, qi, kv: (b, 0, qi, kv))
        else:   # shared (1, 1, S, S) mask — same tiles re-used across b.
            m_spec = pl.BlockSpec((1, 1, tq, tkv),
                                  lambda b, qi, kv: (0, 0, qi, kv))
        in_specs.append(m_spec)
        operands.append(mask)

    pq, pk, pv = qkv_idxs

    def _q_spec(p):
        return pl.BlockSpec((1, 1, tq, D), lambda b, qi, kv: (p, b, qi, 0))

    def _kv_spec(p):
        return pl.BlockSpec((1, 1, tkv, D), lambda b, qi, kv: (p, b, kv, 0))

    in_specs += [_q_spec(pq), _kv_spec(pk), _kv_spec(pv)]
    operands += [q_arr, k_arr, v_arr]

    fuse_wo = wo is not None
    if fuse_wo:
        in_specs += [pl.BlockSpec((D, D), lambda b, qi, kv: (0, 0)),
                     pl.BlockSpec((1, D), lambda b, qi, kv: (0, 0))]
        operands += [wo, bo.reshape(1, D).astype(jnp.float32)]

    kernel = functools.partial(
        _flash_attention_kernel, n_heads=H, scale=scale, kv_len=kv_len,
        is_causal=is_causal, has_mask=mask is not None, fuse_wo=fuse_wo)

    out = pl.pallas_call(
        kernel,
        out_shape=jax.ShapeDtypeStruct((B, sq_pad, D), out_dtype),
        grid=grid,
        in_specs=in_specs,
        out_specs=pl.BlockSpec((1, tq, D), lambda b, qi, kv: (b, qi, 0)),
        scratch_shapes=[
            pltpu.VMEM((H, tq, d_k), q_arr.dtype),   # relayouted, scaled Q
            pltpu.VMEM((H, tq, 1), jnp.float32),     # running max
            pltpu.VMEM((H, tq, 1), jnp.float32),     # running sum
            pltpu.VMEM((H, tq, d_k), jnp.float32),   # output accumulator
        ],
        compiler_params=pltpu.CompilerParams(
            # Batch axis leading & parallel (megacore shards b, not qi);
            # kv is the online-softmax reduction axis -> "arbitrary", last.
            dimension_semantics=("parallel", "parallel", "arbitrary"),
            vmem_limit_bytes=_VMEM_LIMIT),
    )(*operands)

    if sq_pad != S:
        out = out[:, :S, :]
    return out


# ----------------------------- module wrapper --------------------------------

def init_mha_params(key, d_model):
    """Deterministic init mirroring nn.Linear default (uniform +-1/sqrt(fan_in))."""
    bound = 1.0 / math.sqrt(d_model)
    params = {}
    for i, name in enumerate(["w_q", "w_k", "w_v", "w_o"]):
        kw, kb = jax.random.split(jax.random.fold_in(key, i))
        # stored as (Din, Dout) so y = x @ W + b  (== PyTorch x @ W.T + b)
        params[name] = {
            "w": jax.random.uniform(kw, (d_model, d_model), jnp.float32,
                                    -bound, bound),
            "b": jax.random.uniform(kb, (d_model,), jnp.float32, -bound, bound),
        }
    return params


def multi_head_attention(params, query, key, value, n_heads, mask=None,
                         is_causal=False, compute_dtype=jnp.float32):
    """query/key/value: (B, S, D) -> (B, S, D).

    mask: optional 0/1 mask broadcastable to (B, 1, S, S) (PyTorch
    masked_fill(mask == 0, -1e9) semantics).  is_causal=True generates a
    causal mask in-kernel (no mask operand needed).
    compute_dtype: MXU input dtype (bf16 recommended on v6e/v7x); softmax and
    accumulation stay float32; final output keeps the input dtype.
    """
    B, S, D = query.shape
    d_k = D // n_heads
    scale = 1.0 / math.sqrt(d_k)
    cdt = compute_dtype

    wq = params["w_q"]["w"].astype(cdt); bq = params["w_q"]["b"]
    wk = params["w_k"]["w"].astype(cdt); bk = params["w_k"]["b"]
    wv = params["w_v"]["w"].astype(cdt); bv = params["w_v"]["b"]
    wo = params["w_o"]["w"].astype(cdt); bo = params["w_o"]["b"]

    if (query is key) and (key is value):
        # Self-attention: ONE fused pallas_call for Q/K/V (stacked weights,
        # x streamed from HBM through a single pipelined grid).
        x2d = query.reshape(B * S, D).astype(cdt)
        qkv = pallas_linear(x2d, jnp.stack([wq, wk, wv]),
                            jnp.stack([bq, bk, bv]), out_dtype=cdt)
        qkv4 = qkv.reshape(3, B, S, D)
        arrs, idxs = (qkv4, qkv4, qkv4), (0, 1, 2)
    else:
        Q = pallas_linear(query.reshape(B * S, D).astype(cdt),
                          wq[None], bq[None], out_dtype=cdt).reshape(1, B, S, D)
        K = pallas_linear(key.reshape(B * S, D).astype(cdt),
                          wk[None], bk[None], out_dtype=cdt).reshape(1, B, S, D)
        V = pallas_linear(value.reshape(B * S, D).astype(cdt),
                          wv[None], bv[None], out_dtype=cdt).reshape(1, B, S, D)
        arrs, idxs = (Q, K, V), (0, 0, 0)

    mask4 = None
    if mask is not None:
        m = jnp.asarray(mask)
        if m.ndim < 4:
            m = m.reshape((1,) * (4 - m.ndim) + m.shape)
        if m.shape[1] != 1:
            # TODO(synk): per-head masks would need an H-indexed mask BlockSpec.
            raise NotImplementedError("per-head attention masks not supported")
        # int8 0/1 mask: 4x less HBM traffic / VMEM than float32.
        mask4 = jnp.broadcast_to((m != 0).astype(jnp.int8),
                                 (m.shape[0], 1, S, S))

    # Fuse the output projection into the attention epilogue whenever the
    # (D, D) weight fits comfortably in VMEM (removes a (B,S,D) HBM round trip
    # of the context tensor and one kernel launch).
    fuse_wo = D * D * jnp.dtype(cdt).itemsize <= 8 * 1024 * 1024
    if fuse_wo:
        out = pallas_flash_attention(
            arrs, idxs, n_heads, scale=scale, mask=mask4, is_causal=is_causal,
            wo=wo, bo=bo, out_dtype=query.dtype)
    else:
        ctx = pallas_flash_attention(
            arrs, idxs, n_heads, scale=scale, mask=mask4, is_causal=is_causal,
            out_dtype=cdt)
        out = pallas_linear(ctx.reshape(B * S, D), wo[None], bo[None],
                            out_dtype=query.dtype)[0].reshape(B, S, D)
    return out


# -------------------------------- reference ----------------------------------

def mha_ref(params, query, key, value, n_heads, mask=None):
    B, S, D = query.shape
    d_k = D // n_heads

    def lin(p, x):
        return x @ p["w"] + p["b"]

    def split(x):
        return x.reshape(B, S, n_heads, d_k).transpose(0, 2, 1, 3)

    Q = split(lin(params["w_q"], query))
    K = split(lin(params["w_k"], key))
    V = split(lin(params["w_v"], value))
    scores = jnp.einsum("bhqd,bhkd->bhqk", Q, K) / math.sqrt(d_k)
    if mask is not None:
        scores = jnp.where(mask == 0, -1e9, scores)
    attn = jax.nn.softmax(scores, axis=-1)
    out = jnp.einsum("bhqk,bhkd->bhqd", attn, V)
    out = out.transpose(0, 2, 1, 3).reshape(B, S, D)
    return lin(params["w_o"], out)


# ---------------------------------- main --------------------------------------

if __name__ == "__main__":
    B, S, D, H = 2, 8, 32, 4   # batch, seq, d_model, n_heads (d_k = 8)

    root = jax.random.PRNGKey(0)
    kq, kk, kv_, kp = jax.random.split(root, 4)
    query = jax.random.normal(kq, (B, S, D), jnp.float32)
    key_t = jax.random.normal(kk, (B, S, D), jnp.float32)
    value = jax.random.normal(kv_, (B, S, D), jnp.float32)
    params = init_mha_params(kp, D)

    causal = jnp.tril(jnp.ones((1, 1, S, S), jnp.float32))

    # 1) cross-attention + explicit (int8-transported) mask, f32 MXU path.
    out = multi_head_attention(params, query, key_t, value, H, mask=causal)
    out = jax.block_until_ready(out)
    ref = mha_ref(params, query, key_t, value, H, mask=causal)
    assert out.shape == (B, S, D)
    assert jnp.allclose(out, ref, atol=1e-2, rtol=1e-2), "f32 mismatch vs ref"

    # 2) self-attention, in-kernel causal mask (iota + kv-tile skip), fused QKV
    #    projection, fused W_o epilogue, bf16 MXU inputs.
    out2 = multi_head_attention(params, query, query, query, H, is_causal=True,
                                compute_dtype=jnp.bfloat16)
    out2 = jax.block_until_ready(out2)
    ref2 = mha_ref(params, query, query, query, H, mask=causal)
    assert out2.shape == (B, S, D)
    err = float(jnp.max(jnp.abs(out2.astype(jnp.float32) - ref2)))
    assert err < 1e-1, f"bf16 path mismatch vs ref (max abs err {err})"

    print("KERNEL_OK")
</pallas_src>

<mosaic_0001>
module attributes {stable_mosaic.version = 11 : i64} {
  func.func @_linear_kernel(%arg0: i32, %arg1: i32, %arg2: i32, %arg3: i32, %arg4: memref<16x32xf32, #tpu.memory_space<vmem>>, %arg5: memref<1x32x32xf32, #tpu.memory_space<vmem>>, %arg6: memref<1x1x32xf32, #tpu.memory_space<vmem>>, %arg7: memref<1x16x32xf32, #tpu.memory_space<vmem>>, %arg8: memref<16x32xf32, #tpu.memory_space<vmem>>) attributes {dimension_semantics = [#tpu.dimension_semantics<parallel>, #tpu.dimension_semantics<parallel>, #tpu.dimension_semantics<parallel>, #tpu.dimension_semantics<arbitrary>], iteration_bounds = array<i64: 1, 1, 1, 1>, scalar_prefetch = 0 : i64, scratch_operands = 1 : i64, tpu.core_type = #tpu.core_type<tc>, window_params = [{transform_indices = @transform_0, window_bounds = array<i64: 16, 32>}, {transform_indices = @transform_1, window_bounds = array<i64: 1, 32, 32>}, {transform_indices = @transform_2, window_bounds = array<i64: 1, 1, 32>}, {transform_indices = @transform_3, window_bounds = array<i64: 1, 16, 32>}]} {
    %c0_i32 = arith.constant 0 : i32
    %0 = arith.cmpi eq, %arg3, %c0_i32 : i32
    %1 = arith.extui %0 : i1 to i32
    %c0_i32_0 = arith.constant 0 : i32
    %2 = arith.cmpi ne, %1, %c0_i32_0 : i32
    scf.if %2 {
      %cst_11 = arith.constant 0.000000e+00 : f32
      %13 = vector.broadcast %cst_11 : f32 to vector<16x32xf32>
      %c0_12 = arith.constant 0 : index
      %c0_13 = arith.constant 0 : index
      %14 = vector.load %arg8[%c0_12, %c0_13] : memref<16x32xf32, #tpu.memory_space<vmem>>, vector<16x32xf32>
      tpu.vector_store %arg8[%c0_12, %c0_13], %13 {strides = array<i32>} : memref<16x32xf32, #tpu.memory_space<vmem>>, vector<16x32xf32>,
    } else {
    }
    %c0 = arith.constant 0 : index
    %c0_1 = arith.constant 0 : index
    %3 = vector.load %arg8[%c0, %c0_1] : memref<16x32xf32, #tpu.memory_space<vmem>>, vector<16x32xf32>
    %c0_2 = arith.constant 0 : index
    %c0_3 = arith.constant 0 : index
    %4 = vector.load %arg4[%c0_2, %c0_3] : memref<16x32xf32, #tpu.memory_space<vmem>>, vector<16x32xf32>
    %c0_4 = arith.constant 0 : index
    %c0_5 = arith.constant 0 : index
    %c0_6 = arith.constant 0 : index
    %5 = vector.load %arg5[%c0_4, %c0_5, %c0_6] : memref<1x32x32xf32, #tpu.memory_space<vmem>>, vector<1x32x32xf32>
    %6 = vector.shape_cast %5 : vector<1x32x32xf32> to vector<32x32xf32>
    %cst = arith.constant dense<0.000000e+00> : vector<16x32xf32>
    %7 = tpu.matmul %4, %6, %cst {dimension_numbers = #tpu.dot_dimension_numbers<[1], [0], [0], [1], [0, 0, 1, 1], [], []>} : vector<16x32xf32>, vector<32x32xf32>, vector<16x32xf32> -> vector<16x32xf32>
    %8 = arith.addf %3, %7 : vector<16x32xf32>
    %c0_7 = arith.constant 0 : index
    %c0_8 = arith.constant 0 : index
    %9 = vector.load %arg8[%c0_7, %c0_8] : memref<16x32xf32, #tpu.memory_space<vmem>>, vector<16x32xf32>
    tpu.vector_store %arg8[%c0_7, %c0_8], %8 {strides = array<i32>} : memref<16x32xf32, #tpu.memory_space<vmem>>, vector<16x32xf32>,
    %c0_i32_9 = arith.constant 0 : i32
    %10 = arith.cmpi eq, %arg3, %c0_i32_9 : i32
    %11 = arith.extui %10 : i1 to i32
    %c0_i32_10 = arith.constant 0 : i32
    %12 = arith.cmpi ne, %11, %c0_i32_10 : i32
    scf.if %12 {
      %c0_11 = arith.constant 0 : index
      %c0_12 = arith.constant 0 : index
      %13 = vector.load %arg8[%c0_11, %c0_12] : memref<16x32xf32, #tpu.memory_space<vmem>>, vector<16x32xf32>
      %c0_13 = arith.constant 0 : index
      %c0_14 = arith.constant 0 : index
      %c0_15 = arith.constant 0 : index
      %14 = vector.load %arg6[%c0_13, %c0_14, %c0_15] : memref<1x1x32xf32, #tpu.memory_space<vmem>>, vector<1x1x32xf32>
      %15 = vector.shape_cast %14 : vector<1x1x32xf32> to vector<1x32xf32>
      %16 = vector.broadcast %15 : vector<1x32xf32> to vector<16x32xf32>
      %17 = arith.addf %13, %16 : vector<16x32xf32>
      %c0_16 = arith.constant 0 : index
      %c0_17 = arith.constant 0 : index
      %c0_18 = arith.constant 0 : index
      %18 = vector.load %arg7[%c0_16, %c0_17, %c0_18] : memref<1x16x32xf32, #tpu.memory_space<vmem>>, vector<1x16x32xf32>
      %19 = vector.shape_cast %18 : vector<1x16x32xf32> to vector<16x32xf32>
      %20 = vector.shape_cast %17 : vector<16x32xf32> to vector<1x16x32xf32>
      tpu.vector_store %arg7[%c0_16, %c0_17, %c0_18], %20 {strides = array<i32>} : memref<1x16x32xf32, #tpu.memory_space<vmem>>, vector<1x16x32xf32>,
    } else {
    }
    return
  }
  func.func @transform_0(%arg0: i32, %arg1: i32, %arg2: i32, %arg3: i32) -> (i32, i32) {
    %c0_i32 = arith.constant 0 : i32
    return %arg1, %arg3 : i32, i32
  }
  func.func @transform_1(%arg0: i32, %arg1: i32, %arg2: i32, %arg3: i32) -> (i32, i32, i32) {
    %c0_i32 = arith.constant 0 : i32
    return %arg0, %arg3, %arg2 : i32, i32, i32
  }
  func.func @transform_2(%arg0: i32, %arg1: i32, %arg2: i32, %arg3: i32) -> (i32, i32, i32) {
    %c0_i32 = arith.constant 0 : i32
    %c0_i32_0 = arith.constant 0 : i32
    return %arg0, %c0_i32, %arg2 : i32, i32, i32
  }
  func.func @transform_3(%arg0: i32, %arg1: i32, %arg2: i32, %arg3: i32) -> (i32, i32, i32) {
    %c0_i32 = arith.constant 0 : i32
    return %arg0, %arg1, %arg2 : i32, i32, i32
  }
}

</mosaic_0001>

<bundles_post_ra>
// kernel: tpu_custom_call.1
= control target key start
LH: loop header
LB: loop body
LE: loop exit
PB: predicated region body
PF: predicated region fallthrough
CT: control target
= control target key end

     0   :  { %8 = vsyncpa [#allocation4], 0  ;;  %s275_s0 = inlined_call_operand.hbm [shape: f32[16,32], index: 0, kind: input, shape index: {}]   ;;  %s276_s1 = inlined_call_operand.hbm [shape: f32[1,32,32], index: 1, kind: input, shape index: {}]   ;;  %s277_s2 = inlined_call_operand.vmem [shape: f32[1,1,32], index: 2, kind: input, shape index: {}]   ;;  %s278_s3 = inlined_call_operand.hbm [shape: f32[1,16,32], index: 3, kind: output, shape index: {}]  }
   0x1   :  { %9 = vsyncpa [#allocation7], 0 }
   0x2   :  { %10 = vsyncpa [#allocation5], 0  ;;  %s15_s14 = sshll.u32 %s275_s0, 4  ;;  %s220_s15 = smov [#allocation3]   ;;  %s16_s14 = int_to_ptr.hbm [resolvable:$true] %s15_s14 }
   0x3   :  { %s17_s16 = sshll.u32 %s220_s15, 4  ;;  %s28_s19 = sshll.u32 %s276_s1, 4  ;;  %s18_s16 = int_to_ptr.vmem [resolvable:$true] %s17_s16  ;;  %s29_s19 = int_to_ptr.hbm [resolvable:$true] %s28_s19 }
   0x4   :  { %s221_s20 = smov 128   ;;  %s222_s21 = smov 8  }
   0x5   :  { %23 = dma.hbm_to_vmem [thread:$0]  %s16_s14, 256, %s18_s16, [#allocation4], %s221_s20, %s221_s20, %s222_s21  }
   0x6   :  { %s223_s22 = smov [#allocation6]  }
   0x7   :  { %s30_s23 = sshll.u32 %s223_s22, 4  ;;  %s31_s23 = int_to_ptr.vmem [resolvable:$true] %s30_s23 }
   0x8   :  { %36 = dma.hbm_to_vmem [thread:$0]  %s29_s19, 512, %s31_s23, [#allocation7], %s221_s20, %s221_s20, %s222_s21  }
   0x9   :  { %214 = dma.done.wait [#allocation4], 256  }
   0xa   :  { %215 = vsyncadd [#allocation4], 4294967040 }
   0xb   :  { %216 = dma.done.wait [#allocation7], 512  }
   0xc   :  { %217 = vsyncadd [#allocation7], 4294966784  ;;  %vm51_vm0 = vcmask 261120   ;;  %v224_v0 = vmov 0.0   ;;  %v61_v1 = vld [vmem:[#allocation6 + $0x18] sm:$0xff]  ;;  %v60_v2 = vld [vmem:[#allocation6 + $0x10] sm:$0xff] }
   0xd   :  { %52 = vst.msk [vmem:[#allocation2] sm:$0xff] %vm51_vm0, %v224_v0  ;;  %81 = vmatpush.msra.mxu0 %v61_v1  ;;  %131 = vmatpush.msra.mxu1 %v61_v1  ;;  %v59_v3 = vld [vmem:[#allocation6 + $0x8] sm:$0xff]  ;;  %v58_v4 = vld [vmem:[#allocation6] sm:$0xff]  ;;  %v56_v5 = vld [vmem:[#allocation3] sm:$0xff]  ;;  %s225_s24 = smov [#allocation8]   ;;  %s115_s28 = sshll.u32 %s278_s3, 4  ;;  %s116_s28 = int_to_ptr.hbm [resolvable:$true] %s115_s28 }
   0xe   :  { %53 = vst.msk [vmem:[#allocation2 + $0x8] sm:$0xff] %vm51_vm0, %v224_v0  ;;  %v57_v6 = vld [vmem:[#allocation3 + $0x8] sm:$0xff]  ;;  %v141_v13 = vld [vmem:[%s277_s2] ss:$0 sm:$0xff]  ;;  %s113_s25 = sshll.u32 %s225_s24, 4  ;;  %s114_s25 = int_to_ptr.vmem [resolvable:$true] %s113_s25 }
   0xf   :  { %82 = vmatpush.msra.mxu0 %v60_v2  ;;  %132 = vmatpush.msra.mxu1 %v60_v2 }
  0x11   :  { %83 = vmatpush.msra.mxu0 %v59_v3  ;;  %133 = vmatpush.msra.mxu1 %v59_v3 }
  0x13   :  { %84 = vmatpush.msra.mxu0 %v58_v4  ;;  %134 = vmatpush.msra.mxu1 %v58_v4 }
  0x14   :  { %129 = vmatmul.msk.f32.vlgmr.msra.gmra.mxu0 %vm51_vm0, %v56_v5  ;;  %130 = vmatmul.msk.f32.vlgmr.msra.gmra.mxu1 %vm51_vm0, %v57_v6  ;;  %v54_v7 = vld [vmem:[#allocation2] sm:$0xff] }
  0x15   :  { %v55_v8 = vld [vmem:[#allocation2 + $0x8] sm:$0xff] }
  0x91   :  { %v86_v9 = vpop.f32.mrf.mxu0  ;;  %v89_v10 = vpop.f32.mrf.mxu1 }
  0x92   :  { %v92_v11 = vadd.f32 %v86_v9, %v54_v7  ;;  %v93_v12 = vadd.f32 %v89_v10, %v55_v8 }
  0x94   :  { %94 = vst.msk [vmem:[#allocation2] sm:$0xff] %vm51_vm0, %v92_v11 }
  0x95   :  { %95 = vst.msk [vmem:[#allocation2 + $0x8] sm:$0xff] %vm51_vm0, %v93_v12 }
  0x9b   :  { %v99_v14 = vld [vmem:[#allocation2] sm:$0xff] }
  0x9c   :  { %v100_v15 = vld [vmem:[#allocation2 + $0x8] sm:$0xff]  ;;  %v105_v16 = vadd.f32 %v141_v13, %v99_v14 }
  0x9d   :  { %v106_v17 = vadd.f32 %v141_v13, %v100_v15 }
  0x9e   :  { %107 = vst.msk [vmem:[#allocation8] sm:$0xff] %vm51_vm0, %v105_v16 }
  0x9f   :  { %108 = vst.msk [vmem:[#allocation8 + $0x8] sm:$0xff] %vm51_vm0, %v106_v17 }
  0xa0   :  { %121 = dma.vmem_to_hbm [thread:$0]  %s114_s25, 256, %s116_s28, [#allocation5], %s221_s20, %s221_s20, %s222_s21  }
  0xa1   :  { %218 = dma.done.wait [#allocation5], 256  }
  0xa2   :  { %219 = vsyncadd [#allocation5], 4294967040 }
  0xa3   :  { %126 = vsyncpa [#allocation4], 1 }
  0xa4   :  { %127 = vsyncpa [#allocation7], 1 }
  0xa5   :  { %128 = vsyncpa [#allocation5], 1 }

</bundles_post_ra>
